<compile_context>
chip_gen: v7x
topology: tpu7x:2x2x1
jax: 0.10.0
libtpu: 0.0.40
codegen_flags: <defaults>
</compile_context>

<pallas_src>
import jax
import jax.numpy as jnp
from jax.experimental import pallas as pl
from jax.experimental.pallas import tpu as pltpu

_LANE = 128
_PACK = 16  # bf16 sublane packing -> batch-tile alignment


def _round_up(n, m):
    return ((n + m - 1) // m) * m


def _cdiv(a, b):
    return (a + b - 1) // b


def _num_tensorcores():
    """Best-effort TensorCore count per device (2 on v7x); falls back to 1."""
    try:
        d = jax.devices()[0]
        n = getattr(d, "num_cores", None) or getattr(d, "core_count", None) or 1
        return max(1, int(n))
    except Exception:
        return 1


def _choose_batch_tile(B, block_b, num_cores):
    """Pick (TB, steps): big 16-aligned batch tiles, balanced step count."""
    B_aligned = _round_up(max(B, _PACK), _PACK)
    block_b = _round_up(max(block_b, _PACK), _PACK)
    steps = _cdiv(B_aligned, block_b)
    if num_cores > 1 and steps > 1:
        # Balance the "parallel" batch grid across the chip's TensorCores.
        steps = _round_up(steps, num_cores)
    TB = _round_up(_cdiv(B_aligned, steps), _PACK)
    return TB, steps


def _qnet_kernel(x_ref, w1_ref, b1_ref, w2_ref, b2_ref, o_ref):
    # hidden = relu(x @ W1 + b1): bf16 MXU inputs, f32 accumulate/elementwise.
    h = jnp.dot(x_ref[...], w1_ref[...], preferred_element_type=jnp.float32)
    h = jnp.maximum(h + b1_ref[...], 0.0)              # (TB, Hp) f32
    # out = h @ W2 + b2
    y = jnp.dot(h.astype(jnp.bfloat16), w2_ref[...],
                preferred_element_type=jnp.float32)
    o_ref[...] = (y + b2_ref[...]).astype(o_ref.dtype)


def prepare_params(w1, b1, w2, b2):
    """Pad H/O to 128-multiples (lane-dense) and cast weights to bf16.

    w1: (In, H), b1: (H,) or (1, H), w2: (H, O), b2: (O,) or (1, O) — all f32,
    stored (in, out), i.e. transposed relative to PyTorch's nn.Linear weight.

    `In` (the first matmul's K) stays UNPADDED so the wrapper never writes an
    8x lane-padded copy of the input to HBM.  Zero pads on H/O never leak into
    real outputs: padded hidden columns are relu(0 + 0) = 0 and padded output
    columns are sliced off by the wrapper.
    """
    w1 = jnp.asarray(w1, jnp.float32)
    w2 = jnp.asarray(w2, jnp.float32)
    b1 = jnp.asarray(b1, jnp.float32).reshape(1, -1)
    b2 = jnp.asarray(b2, jnp.float32).reshape(1, -1)
    In, H = w1.shape
    H2, O = w2.shape
    assert H == H2 and b1.shape[1] == H and b2.shape[1] == O

    H_p = _round_up(H, _LANE)
    O_p = _round_up(O, _LANE)

    w1_p = jnp.zeros((In, H_p), jnp.bfloat16).at[:, :H].set(w1.astype(jnp.bfloat16))
    w2_p = jnp.zeros((H_p, O_p), jnp.bfloat16).at[:H, :O].set(w2.astype(jnp.bfloat16))
    b1_p = jnp.zeros((1, H_p), jnp.float32).at[:, :H].set(b1)
    b2_p = jnp.zeros((1, O_p), jnp.float32).at[:, :O].set(b2)
    return (w1_p, b1_p, w2_p, b2_p, In, O)


def linear_qnet_forward(x, params, block_b=1024, small_batch_threshold=64,
                        out_dtype=jnp.float32):
    """x: (B, In); params: prepare_params output. Returns (B, O) in out_dtype.

    block_b is an upper bound on the batch tile; big tiles are best on every
    generation (v5e/v6e/v7x) because the kernel is DMA- and step-overhead
    bound, not MXU bound.  Call under jit so the final slice fuses with the
    consumer.
    """
    w1_p, b1_p, w2_p, b2_p, in_features, out_features = params
    B, In = x.shape
    assert In == in_features, (In, in_features)
    H_p = w1_p.shape[1]
    O_p = w2_p.shape[1]

    if B < small_batch_threshold:
        # Tiny-batch fast path (single-state action selection): launch-bound
        # either way, so skip Pallas dispatch and pad copies; same numerics.
        h = jnp.maximum(
            jnp.dot(x.astype(jnp.bfloat16), w1_p,
                    preferred_element_type=jnp.float32) + b1_p, 0.0)
        y = jnp.dot(h.astype(jnp.bfloat16), w2_p,
                    preferred_element_type=jnp.float32) + b2_p
        return y[:, :out_features].astype(out_dtype)

    TB, steps = _choose_batch_tile(B, block_b, _num_tensorcores())
    B_p = TB * steps

    # Only the batch dim is padded; the bf16 cast is fused into the pad copy
    # (halves the dominant input DMA stream; no copy at all when B == B_p).
    xb = x.astype(jnp.bfloat16)
    x_p = xb if B_p == B else jnp.zeros((B_p, In), jnp.bfloat16).at[:B, :].set(xb)

    cost = pl.CostEstimate(
        flops=2 * B_p * (In * H_p + H_p * O_p),
        transcendentals=0,
        bytes_accessed=(x_p.size * 2 + w1_p.size * 2 + w2_p.size * 2
                        + b1_p.size * 4 + b2_p.size * 4
                        + B_p * O_p * jnp.dtype(out_dtype).itemsize),
    )

    out_p = pl.pallas_call(
        _qnet_kernel,
        out_shape=jax.ShapeDtypeStruct((B_p, O_p), out_dtype),
        grid=(steps,),
        in_specs=[
            # Batch-tiled bf16 input with its TRUE feature width (last block
            # dim == full array extent is legal; no 8x lane pad in HBM).
            pl.BlockSpec((TB, In), lambda i: (i, 0)),
            pl.BlockSpec((In, H_p), lambda i: (0, 0)),   # W1 resident in VMEM
            pl.BlockSpec((1, H_p), lambda i: (0, 0)),    # b1 resident
            pl.BlockSpec((H_p, O_p), lambda i: (0, 0)),  # W2 resident
            pl.BlockSpec((1, O_p), lambda i: (0, 0)),    # b2 resident
        ],
        out_specs=pl.BlockSpec((TB, O_p), lambda i: (i, 0)),  # lane-dense store
        compiler_params=pltpu.CompilerParams(
            dimension_semantics=("parallel",)),  # batch grid shards over TCs
        cost_estimate=cost,
    )(x_p, w1_p, b1_p, w2_p, b2_p)

    # NOTE: padded batch rows compute relu(b1) @ W2 + b2 (garbage); they are
    # discarded here and must never be reduced over inside the kernel.
    return out_p[:B, :out_features]


def init_params(key, input_size, hidden_size, output_size):
    """Deterministic init mimicking nn.Linear (uniform +/- 1/sqrt(fan_in))."""
    k1, k2, k3, k4 = jax.random.split(key, 4)
    lim1 = 1.0 / jnp.sqrt(input_size)
    lim2 = 1.0 / jnp.sqrt(hidden_size)
    # Stored as (in, out) = transpose of PyTorch's (out, in) weight layout.
    w1 = jax.random.uniform(k1, (input_size, hidden_size), jnp.float32, -lim1, lim1)
    b1 = jax.random.uniform(k2, (1, hidden_size), jnp.float32, -lim1, lim1)
    w2 = jax.random.uniform(k3, (hidden_size, output_size), jnp.float32, -lim2, lim2)
    b2 = jax.random.uniform(k4, (1, output_size), jnp.float32, -lim2, lim2)
    return w1, b1, w2, b2


# TODO(synk): Linear_Qnet.save() (torch.save of the state dict) is host-side
# file I/O with no Pallas equivalent; not implemented.

if __name__ == "__main__":
    # Shapes consistent with Linear_Qnet(input_size, hidden_size, output_size).
    input_size, hidden_size, output_size = 16, 32, 8

    key = jax.random.PRNGKey(0)
    kx, kp, kb = jax.random.split(key, 3)
    w1, b1, w2, b2 = init_params(kp, input_size, hidden_size, output_size)
    params = prepare_params(w1, b1, w2, b2)

    def ref_f32(xx):
        return jnp.maximum(xx @ w1 + b1, 0.0) @ w2 + b2

    # 1) Pallas path, single grid step (replay-buffer style minibatch).
    x = jax.random.normal(kx, (128, input_size), jnp.float32)
    fwd = jax.jit(lambda xx: linear_qnet_forward(xx, params))
    out = fwd(x)
    jax.block_until_ready(out)
    assert out.shape == (128, output_size)

    # Tight check against a reference with the kernel's exact numerics
    # (bf16 matmul inputs, f32 accumulate / bias / relu).
    bf16 = jnp.bfloat16
    h_ref = jnp.maximum(
        jnp.dot(x.astype(bf16), w1.astype(bf16),
                preferred_element_type=jnp.float32) + b1, 0.0)
    ref_bf = jnp.dot(h_ref.astype(bf16), w2.astype(bf16),
                     preferred_element_type=jnp.float32) + b2
    assert jnp.allclose(out, ref_bf, atol=1e-4, rtol=1e-4)
    # Looser check against the original all-f32 module semantics.
    assert jnp.allclose(out, ref_f32(x), atol=5e-2, rtol=5e-2)

    # 2) Pallas path, multi-step grid with a ragged batch (forces grid > 1).
    xb = jax.random.normal(kb, (600, input_size), jnp.float32)
    fwd_tiled = jax.jit(lambda xx: linear_qnet_forward(xx, params, block_b=256))
    outb = fwd_tiled(xb)
    jax.block_until_ready(outb)
    assert outb.shape == (600, output_size)
    assert jnp.allclose(outb, ref_f32(xb), atol=5e-2, rtol=5e-2)

    # 3) Small-batch fast path (single-state action selection).
    xs = x[:4]
    outs = linear_qnet_forward(xs, params)
    jax.block_until_ready(outs)
    assert outs.shape == (4, output_size)
    assert jnp.allclose(outs, ref_f32(xs), atol=5e-2, rtol=5e-2)

    print("KERNEL_OK")
</pallas_src>

<mosaic_0001>
module attributes {stable_mosaic.version = 11 : i64} {
  func.func @_qnet_kernel(%arg0: i32, %arg1: memref<128x16xbf16, #tpu.memory_space<vmem>>, %arg2: memref<16x128xbf16, #tpu.memory_space<vmem>>, %arg3: memref<1x128xf32, #tpu.memory_space<vmem>>, %arg4: memref<128x128xbf16, #tpu.memory_space<vmem>>, %arg5: memref<1x128xf32, #tpu.memory_space<vmem>>, %arg6: memref<128x128xf32, #tpu.memory_space<vmem>>) attributes {dimension_semantics = [#tpu.dimension_semantics<parallel>], iteration_bounds = array<i64: 1>, scalar_prefetch = 0 : i64, scratch_operands = 0 : i64, tpu.core_type = #tpu.core_type<tc>, window_params = [{transform_indices = @transform_0, window_bounds = array<i64: 128, 16>}, {pipeline_mode = #tpu.pipeline_mode<synchronous>, transform_indices = @transform_1, window_bounds = array<i64: 16, 128>}, {pipeline_mode = #tpu.pipeline_mode<synchronous>, transform_indices = @transform_2, window_bounds = array<i64: 1, 128>}, {pipeline_mode = #tpu.pipeline_mode<synchronous>, transform_indices = @transform_3, window_bounds = array<i64: 128, 128>}, {pipeline_mode = #tpu.pipeline_mode<synchronous>, transform_indices = @transform_4, window_bounds = array<i64: 1, 128>}, {transform_indices = @transform_5, window_bounds = array<i64: 128, 128>}]} {
    %c0 = arith.constant 0 : index
    %c0_0 = arith.constant 0 : index
    %0 = vector.load %arg1[%c0, %c0_0] : memref<128x16xbf16, #tpu.memory_space<vmem>>, vector<128x16xbf16>
    %c0_1 = arith.constant 0 : index
    %c0_2 = arith.constant 0 : index
    %1 = vector.load %arg2[%c0_1, %c0_2] : memref<16x128xbf16, #tpu.memory_space<vmem>>, vector<16x128xbf16>
    %cst = arith.constant dense<0.000000e+00> : vector<128x128xf32>
    %2 = tpu.matmul %0, %1, %cst {dimension_numbers = #tpu.dot_dimension_numbers<[1], [0], [0], [1], [0, 0, 1, 1], [], []>} : vector<128x16xbf16>, vector<16x128xbf16>, vector<128x128xf32> -> vector<128x128xf32>
    %c0_3 = arith.constant 0 : index
    %c0_4 = arith.constant 0 : index
    %3 = vector.load %arg3[%c0_3, %c0_4] : memref<1x128xf32, #tpu.memory_space<vmem>>, vector<1x128xf32>
    %4 = vector.broadcast %3 : vector<1x128xf32> to vector<128x128xf32>
    %5 = arith.addf %2, %4 : vector<128x128xf32>
    %cst_5 = arith.constant 0.000000e+00 : f32
    %6 = vector.broadcast %cst_5 : f32 to vector<128x128xf32>
    %7 = arith.maximumf %5, %6 : vector<128x128xf32>
    %8 = arith.truncf %7 : vector<128x128xf32> to vector<128x128xbf16>
    %c0_6 = arith.constant 0 : index
    %c0_7 = arith.constant 0 : index
    %9 = vector.load %arg4[%c0_6, %c0_7] : memref<128x128xbf16, #tpu.memory_space<vmem>>, vector<128x128xbf16>
    %cst_8 = arith.constant dense<0.000000e+00> : vector<128x128xf32>
    %10 = tpu.matmul %8, %9, %cst_8 {dimension_numbers = #tpu.dot_dimension_numbers<[1], [0], [0], [1], [0, 0, 1, 1], [], []>} : vector<128x128xbf16>, vector<128x128xbf16>, vector<128x128xf32> -> vector<128x128xf32>
    %c0_9 = arith.constant 0 : index
    %c0_10 = arith.constant 0 : index
    %11 = vector.load %arg5[%c0_9, %c0_10] : memref<1x128xf32, #tpu.memory_space<vmem>>, vector<1x128xf32>
    %12 = vector.broadcast %11 : vector<1x128xf32> to vector<128x128xf32>
    %13 = arith.addf %10, %12 : vector<128x128xf32>
    %c0_11 = arith.constant 0 : index
    %c0_12 = arith.constant 0 : index
    %14 = vector.load %arg6[%c0_11, %c0_12] : memref<128x128xf32, #tpu.memory_space<vmem>>, vector<128x128xf32>
    tpu.vector_store %arg6[%c0_11, %c0_12], %13 {strides = array<i32>} : memref<128x128xf32, #tpu.memory_space<vmem>>, vector<128x128xf32>,
    return
  }
  func.func @transform_0(%arg0: i32) -> (i32, i32) {
    %c0_i32 = arith.constant 0 : i32
    %c0_i32_0 = arith.constant 0 : i32
    return %arg0, %c0_i32 : i32, i32
  }
  func.func @transform_1(%arg0: i32) -> (i32, i32) {
    %c0_i32 = arith.constant 0 : i32
    %c0_i32_0 = arith.constant 0 : i32
    %c0_i32_1 = arith.constant 0 : i32
    return %c0_i32, %c0_i32_0 : i32, i32
  }
  func.func @transform_2(%arg0: i32) -> (i32, i32) {
    %c0_i32 = arith.constant 0 : i32
    %c0_i32_0 = arith.constant 0 : i32
    %c0_i32_1 = arith.constant 0 : i32
    return %c0_i32, %c0_i32_0 : i32, i32
  }
  func.func @transform_3(%arg0: i32) -> (i32, i32) {
    %c0_i32 = arith.constant 0 : i32
    %c0_i32_0 = arith.constant 0 : i32
    %c0_i32_1 = arith.constant 0 : i32
    return %c0_i32, %c0_i32_0 : i32, i32
  }
  func.func @transform_4(%arg0: i32) -> (i32, i32) {
    %c0_i32 = arith.constant 0 : i32
    %c0_i32_0 = arith.constant 0 : i32
    %c0_i32_1 = arith.constant 0 : i32
    return %c0_i32, %c0_i32_0 : i32, i32
  }
  func.func @transform_5(%arg0: i32) -> (i32, i32) {
    %c0_i32 = arith.constant 0 : i32
    %c0_i32_0 = arith.constant 0 : i32
    return %arg0, %c0_i32 : i32, i32
  }
}

</mosaic_0001>

<bundles_post_ra>
// kernel: _lambda_.1
= control target key start
LH: loop header
LB: loop body
LE: loop exit
PB: predicated region body
PF: predicated region fallthrough
CT: control target
= control target key end

     0   :  { %vm92_vm0 = vcmask 130048   ;;  %s704_s1 = inlined_call_operand.vmem [shape: bf16[16,128], index: 1, kind: input, shape index: {}]   ;;  %s705_s0 = inlined_call_operand.vmem [shape: bf16[128,16], index: 0, kind: input, shape index: {}]   ;;  %s706_s3 = inlined_call_operand.vmem [shape: bf16[128,128], index: 3, kind: input, shape index: {}]   ;;  %s707_s2 = inlined_call_operand.vmem [shape: f32[1,128], index: 2, kind: input, shape index: {}]   ;;  %s708_s4 = inlined_call_operand.vmem [shape: f32[1,128], index: 4, kind: input, shape index: {}]   ;;  %s709_s5 = inlined_call_operand.vmem [shape: f32[128,128], index: 5, kind: output, shape index: {}]  }
   0x1   :  { %v544_v0 = vld [vmem:[%s704_s1] sm:$0xff]   ;;  %v546_v2 = vld [vmem:[%s705_s0 + $0x8] sm:$0xff]   ;;  %v547_v3 = vld [vmem:[%s705_s0 + $0x10] sm:$0xff]  }
   0x2   :  { %v545_v1 = vld [vmem:[%s705_s0] sm:$0xff]   ;;  %478 = vmatprep.subr.bf16.mxu0 %v544_v0  ;;  %v548_v4 = vld [vmem:[%s705_s0 + $0x18] sm:$0xff]   ;;  %v554_v6 = vld [vmem:[%s706_s3 + $0x8] sm:$0xff]  }
   0x3   :  { %479 = vmatpush3.bf16.msra.mxu0 %v544_v0  ;;  %480 = vmatprep.mubr.msk.bf16.mxu0 %vm92_vm0, %v545_v1  ;;  %v553_v5 = vld [vmem:[%s706_s3] sm:$0xff]   ;;  %v555_v8 = vld [vmem:[%s706_s3 + $0x10] sm:$0xff]   ;;  %v556_v9 = vld [vmem:[%s706_s3 + $0x18] sm:$0xff]  }
   0x4   :  { %v549_v7 = vld [vmem:[%s705_s0 + $0x20] sm:$0xff]   ;;  %496 = vmatprep.subr.bf16.mxu0 %v553_v5  ;;  %528 = vmatprep.subr.bf16.mxu1 %v553_v5  ;;  %v550_v10 = vld [vmem:[%s705_s0 + $0x28] sm:$0xff]   ;;  %v551_v11 = vld [vmem:[%s705_s0 + $0x30] sm:$0xff]  }
   0x5   :  { %536 = vmatpush3.bf16.msra.mxu1 %v553_v5  ;;  %v557_v12 = vld [vmem:[%s706_s3 + $0x20] sm:$0xff]   ;;  %v558_v13 = vld [vmem:[%s706_s3 + $0x28] sm:$0xff]   ;;  %v552_v14 = vld [vmem:[%s705_s0 + $0x38] sm:$0xff]  }
   0x6   :  { %481 = vmatmul.mubr.msk.bf16.vlgmr.msra.gmra.mrb[0].mxu0 %vm92_vm0, %v546_v2  ;;  %529 = vmatprep.subr.bf16.mxu1 %v554_v6  ;;  %v559_v15 = vld [vmem:[%s706_s3 + $0x30] sm:$0xff]   ;;  %v560_v16 = vld [vmem:[%s706_s3 + $0x38] sm:$0xff]   ;;  %v426_v17 = vld [vmem:[%s707_s2] ss:$0 sm:$0xff] }
   0x7   :  { %484 = vmatprep.mubr.msk.bf16.mxu0 %vm92_vm0, %v547_v3  ;;  %497 = vmatpush3.bf16.msra.mxu0 %v553_v5 }
   0x8   :  { %498 = vmatprep.subr.bf16.mxu0 %v554_v6 }
   0x9   :  { %537 = vmatpush3.bf16.msra.mxu1 %v554_v6 }
   0xa   :  { %530 = vmatprep.subr.bf16.mxu1 %v555_v8 }
   0xb   :  { %499 = vmatpush3.bf16.msra.mxu0 %v554_v6 }
   0xc   :  { %500 = vmatprep.subr.bf16.mxu0 %v555_v8 }
   0xd   :  { %538 = vmatpush3.bf16.msra.mxu1 %v555_v8 }
   0xe   :  { %485 = vmatmul.mubr.msk.bf16.gmra.mrb[4].mxu0 %vm92_vm0, %v548_v4  ;;  %531 = vmatprep.subr.bf16.mxu1 %v556_v9 }
   0xf   :  { %488 = vmatprep.mubr.msk.bf16.mxu0 %vm92_vm0, %v549_v7  ;;  %501 = vmatpush3.bf16.msra.mxu0 %v555_v8 }
  0x10   :  { %502 = vmatprep.subr.bf16.mxu0 %v556_v9 }
  0x11   :  { %539 = vmatpush3.bf16.msra.mxu1 %v556_v9 }
  0x12   :  { %532 = vmatprep.subr.bf16.mxu1 %v557_v12 }
  0x13   :  { %503 = vmatpush3.bf16.msra.mxu0 %v556_v9 }
  0x14   :  { %504 = vmatprep.subr.bf16.mxu0 %v557_v12 }
  0x15   :  { %540 = vmatpush3.bf16.msra.mxu1 %v557_v12 }
  0x16   :  { %489 = vmatmul.mubr.msk.bf16.gmra.mrb[8].mxu0 %vm92_vm0, %v550_v10  ;;  %533 = vmatprep.subr.bf16.mxu1 %v558_v13  ;;  %v444_v10 = vld [vmem:[%s708_s4] ss:$0 sm:$0xff] }
  0x17   :  { %492 = vmatprep.mubr.msk.bf16.mxu0 %vm92_vm0, %v551_v11  ;;  %505 = vmatpush3.bf16.msra.mxu0 %v557_v12 }
  0x18   :  { %506 = vmatprep.subr.bf16.mxu0 %v558_v13 }
  0x19   :  { %541 = vmatpush3.bf16.msra.mxu1 %v558_v13 }
  0x1a   :  { %534 = vmatprep.subr.bf16.mxu1 %v559_v15 }
  0x1b   :  { %507 = vmatpush3.bf16.msra.mxu0 %v558_v13 }
  0x1c   :  { %508 = vmatprep.subr.bf16.mxu0 %v559_v15 }
  0x1d   :  { %542 = vmatpush3.bf16.msra.mxu1 %v559_v15 }
  0x1e   :  { %493 = vmatmul.mubr.msk.bf16.gmra.mrb[12].mxu0 %vm92_vm0, %v552_v14  ;;  %535 = vmatprep.subr.bf16.mxu1 %v560_v16 }
  0x1f   :  { %509 = vmatpush3.bf16.msra.mxu0 %v559_v15 }
  0x20   :  { %510 = vmatprep.subr.bf16.mxu0 %v560_v16 }
  0x21   :  { %543 = vmatpush3.bf16.msra.mxu1 %v560_v16 }
  0x23   :  { %511 = vmatpush3.bf16.msra.mxu0 %v560_v16 }
  0xd9   :  { %v482_v18 = vpop.f32.mrb[0].mxu0 }
  0xda   :  { %v160_v19 = vadd.f32 %v482_v18, %v426_v17  ;;  %v151_v20 = vpop.f32.mrb[1].mxu0 }
  0xdb   :  { %v152_v21 = vadd.f32 %v426_v17, %v151_v20  ;;  %v483_v22 = vpop.f32.mrb[2].mxu0 }
  0xdc   :  { %v163_v23 = vadd.f32 %v483_v22, %v426_v17  ;;  %v154_v24 = vpop.f32.mrb[3].mxu0  ;;  %v216_v26 = vmax.f32 %v160_v19, 0.0 }
  0xdd   :  { %v155_v25 = vadd.f32 %v426_v17, %v154_v24  ;;  %v214_v28 = vmax.f32 %v152_v21, 0.0 }
  0xde   :  { %v217_v27 = vmax.f32 %v163_v23, 0.0 }
  0xdf   :  { %v215_v29 = vmax.f32 %v155_v25, 0.0 }
  0xe0   :  { %v231_v30 = vpack.c.bf16 %v217_v27, %v216_v26 }
  0xe1   :  { %v230_v31 = vpack.c.bf16 %v215_v29, %v214_v28  ;;  %v486_v32 = vpop.f32.mrb[4].mxu0 }
  0xe2   :  { %v176_v33 = vadd.f32 %v486_v32, %v426_v17  ;;  %v167_v34 = vpop.f32.mrb[5].mxu0 }
  0xe3   :  { %v168_v35 = vadd.f32 %v426_v17, %v167_v34  ;;  %v487_v36 = vpop.f32.mrb[6].mxu0  ;;  %512 = vmatprep.mubr.bf16.mxu0 %v230_v31 }
  0xe4   :  { %v179_v37 = vadd.f32 %v487_v36, %v426_v17  ;;  %v170_v38 = vpop.f32.mrb[7].mxu0  ;;  %513 = vmatmul.mubr.bf16.vlgmr.msra.gmra.mrb[16].mxu0 %v231_v30  ;;  %v220_v40 = vmax.f32 %v176_v33, 0.0 }
  0xe5   :  { %v171_v39 = vadd.f32 %v426_v17, %v170_v38  ;;  %v218_v42 = vmax.f32 %v168_v35, 0.0 }
  0xe6   :  { %v221_v41 = vmax.f32 %v179_v37, 0.0 }
  0xe7   :  { %v219_v43 = vmax.f32 %v171_v39, 0.0 }
  0xe8   :  { %v233_v44 = vpack.c.bf16 %v221_v41, %v220_v40 }
  0xe9   :  { %v490_v45 = vpop.f32.mrb[8].mxu0  ;;  %v232_v46 = vpack.c.bf16 %v219_v43, %v218_v42 }
  0xea   :  { %v192_v47 = vadd.f32 %v490_v45, %v426_v17  ;;  %v183_v48 = vpop.f32.mrb[9].mxu0 }
  0xeb   :  { %v184_v49 = vadd.f32 %v426_v17, %v183_v48  ;;  %v491_v50 = vpop.f32.mrb[10].mxu0  ;;  %516 = vmatprep.mubr.bf16.mxu1 %v232_v46 }
  0xec   :  { %v195_v51 = vadd.f32 %v491_v50, %v426_v17  ;;  %v186_v52 = vpop.f32.mrb[11].mxu0  ;;  %517 = vmatmul.mubr.bf16.vlgmr.msra.gmra.mrb[0].mxu1 %v233_v44  ;;  %v224_v54 = vmax.f32 %v192_v47, 0.0 }
  0xed   :  { %v187_v53 = vadd.f32 %v426_v17, %v186_v52  ;;  %v222_v56 = vmax.f32 %v184_v49, 0.0 }
  0xee   :  { %v225_v55 = vmax.f32 %v195_v51, 0.0 }
  0xef   :  { %v223_v57 = vmax.f32 %v187_v53, 0.0 }
  0xf0   :  { %v235_v58 = vpack.c.bf16 %v225_v55, %v224_v54 }
  0xf1   :  { %v234_v59 = vpack.c.bf16 %v223_v57, %v222_v56  ;;  %v494_v60 = vpop.f32.mrb[12].mxu0 }
  0xf2   :  { %v208_v61 = vadd.f32 %v494_v60, %v426_v17  ;;  %v199_v62 = vpop.f32.mrb[13].mxu0 }
  0xf3   :  { %v200_v63 = vadd.f32 %v426_v17, %v199_v62  ;;  %v495_v0 = vpop.f32.mrb[14].mxu0  ;;  %520 = vmatprep.mubr.bf16.mxu1 %v234_v59 }
  0xf4   :  { %v211_v1 = vadd.f32 %v495_v0, %v426_v17  ;;  %v202_v2 = vpop.f32.mrb[15].mxu0  ;;  %521 = vmatmul.mubr.bf16.gmra.mrb[4].mxu1 %v235_v58  ;;  %v228_v4 = vmax.f32 %v208_v61, 0.0 }
  0xf5   :  { %v203_v3 = vadd.f32 %v426_v17, %v202_v2  ;;  %v226_v6 = vmax.f32 %v200_v63, 0.0 }
  0xf6   :  { %v229_v5 = vmax.f32 %v211_v1, 0.0 }
  0xf7   :  { %v227_v7 = vmax.f32 %v203_v3, 0.0 }
  0xf8   :  { %v237_v8 = vpack.c.bf16 %v229_v5, %v228_v4 }
  0xf9   :  { %v236_v9 = vpack.c.bf16 %v227_v7, %v226_v6 }
  0xfb   :  { %524 = vmatprep.mubr.bf16.mxu1 %v236_v9 }
  0xfc   :  { %525 = vmatmul.mubr.bf16.gmra.mrb[8].mxu1 %v237_v8 }
 0x1b7   :  { %v514_v11 = vpop.f32.mrb[16].mxu0 }
 0x1b8   :  { %v352_v12 = vadd.f32 %v514_v11, %v444_v10  ;;  %v343_v13 = vpop.f32.mrb[17].mxu0 }
 0x1b9   :  { %v344_v14 = vadd.f32 %v444_v10, %v343_v13  ;;  %v515_v15 = vpop.f32.mrb[18].mxu0 }
 0x1ba   :  { %408 = vst [vmem:[%s709_s5 + $0x10] sm:$0xff] %v352_v12  ;;  %v355_v16 = vadd.f32 %v515_v15, %v444_v10  ;;  %v346_v17 = vpop.f32.mrb[19].mxu0 }
 0x1bb   :  { %406 = vst [vmem:[%s709_s5] sm:$0xff] %v344_v14  ;;  %v347_v18 = vadd.f32 %v444_v10, %v346_v17 }
 0x1bc   :  { %409 = vst [vmem:[%s709_s5 + $0x18] sm:$0xff] %v355_v16 }
 0x1bd   :  { %407 = vst [vmem:[%s709_s5 + $0x8] sm:$0xff] %v347_v18 }
 0x1bf   :  { %v518_v19 = vpop.f32.mrb[0].mxu1 }
 0x1c0   :  { %v368_v20 = vadd.f32 %v518_v19, %v444_v10  ;;  %v359_v21 = vpop.f32.mrb[1].mxu1 }
 0x1c1   :  { %v360_v22 = vadd.f32 %v444_v10, %v359_v21  ;;  %v519_v23 = vpop.f32.mrb[2].mxu1 }
 0x1c2   :  { %412 = vst [vmem:[%s709_s5 + $0x30] sm:$0xff] %v368_v20  ;;  %v371_v24 = vadd.f32 %v519_v23, %v444_v10  ;;  %v362_v25 = vpop.f32.mrb[3].mxu1 }
 0x1c3   :  { %410 = vst [vmem:[%s709_s5 + $0x20] sm:$0xff] %v360_v22  ;;  %v363_v26 = vadd.f32 %v444_v10, %v362_v25 }
 0x1c4   :  { %413 = vst [vmem:[%s709_s5 + $0x38] sm:$0xff] %v371_v24 }
 0x1c5   :  { %411 = vst [vmem:[%s709_s5 + $0x28] sm:$0xff] %v363_v26 }
 0x1c7   :  { %v522_v27 = vpop.f32.mrb[4].mxu1 }
 0x1c8   :  { %v384_v28 = vadd.f32 %v522_v27, %v444_v10  ;;  %v375_v29 = vpop.f32.mrb[5].mxu1 }
 0x1c9   :  { %v376_v30 = vadd.f32 %v444_v10, %v375_v29  ;;  %v523_v31 = vpop.f32.mrb[6].mxu1 }
 0x1ca   :  { %416 = vst [vmem:[%s709_s5 + $0x50] sm:$0xff] %v384_v28  ;;  %v387_v32 = vadd.f32 %v523_v31, %v444_v10  ;;  %v378_v33 = vpop.f32.mrb[7].mxu1 }
 0x1cb   :  { %414 = vst [vmem:[%s709_s5 + $0x40] sm:$0xff] %v376_v30  ;;  %v379_v34 = vadd.f32 %v444_v10, %v378_v33 }
 0x1cc   :  { %417 = vst [vmem:[%s709_s5 + $0x58] sm:$0xff] %v387_v32 }
 0x1cd   :  { %415 = vst [vmem:[%s709_s5 + $0x48] sm:$0xff] %v379_v34 }
 0x1cf   :  { %v526_v35 = vpop.f32.mrb[8].mxu1 }
 0x1d0   :  { %v400_v36 = vadd.f32 %v526_v35, %v444_v10  ;;  %v391_v37 = vpop.f32.mrb[9].mxu1 }
 0x1d1   :  { %v392_v38 = vadd.f32 %v444_v10, %v391_v37  ;;  %v527_v39 = vpop.f32.mrb[10].mxu1 }
 0x1d2   :  { %420 = vst [vmem:[%s709_s5 + $0x70] sm:$0xff] %v400_v36  ;;  %v403_v40 = vadd.f32 %v527_v39, %v444_v10  ;;  %v394_v41 = vpop.f32.mrb[11].mxu1 }
 0x1d3   :  { %418 = vst [vmem:[%s709_s5 + $0x60] sm:$0xff] %v392_v38  ;;  %v395_v42 = vadd.f32 %v444_v10, %v394_v41 }
 0x1d4   :  { %421 = vst [vmem:[%s709_s5 + $0x78] sm:$0xff] %v403_v40 }
 0x1d5   :  { %419 = vst [vmem:[%s709_s5 + $0x68] sm:$0xff] %v395_v42 }

</bundles_post_ra>
